<compile_context>
chip_gen: v5e
topology: v5e:2x2
jax: 0.10.0
libtpu: 0.0.40
codegen_flags: <defaults>
</compile_context>

<pallas_src>
import jax
import jax.numpy as jnp
from jax.experimental import pallas as pl
from jax.experimental.pallas import tpu as pltpu


def _frelu_kernel(xp_ref, w_ref, b_ref, o_ref):
    """One (batch, channel-tile) block of FReLU.

    xp_ref: (1, H+2, W+2, Ct)  zero-padded NHWC input tile
    w_ref : (9, 1, Ct)         BN-folded depthwise 3x3 weights (taps flattened)
    b_ref : (1, 1, Ct)         BN-folded bias
    o_ref : (1, H, W, Ct)      output tile
    """
    H = o_ref.shape[1]
    W = o_ref.shape[2]

    # Depthwise 3x3 conv as 9 shifted multiply-adds (VPU), f32 accumulate.
    acc = None
    for kh in range(3):
        for kw in range(3):
            win = xp_ref[0, kh:kh + H, kw:kw + W, :].astype(jnp.float32)
            wk = w_ref[kh * 3 + kw].astype(jnp.float32)        # (1, Ct)
            term = win * wk
            acc = term if acc is None else acc + term

    y = acc + b_ref[0].astype(jnp.float32)                     # fused BN bias

    # max(x, BN(conv(x))) -- the un-padded x is the interior of the halo tile.
    x_center = xp_ref[0, 1:1 + H, 1:1 + W, :].astype(jnp.float32)
    o_ref[0] = jnp.maximum(x_center, y).astype(o_ref.dtype)


def frelu_pallas(x, conv_w, conv_b, bn_gamma, bn_beta, bn_mean, bn_var,
                 eps: float = 1e-5):
    """FReLU forward: max(x, BN(depthwise_conv3x3(x))).

    x:      (N, C, H, W)   NCHW, like PyTorch
    conv_w: (C, 1, 3, 3)   depthwise (groups=C) conv weight
    conv_b: (C,)           conv bias
    bn_*:   (C,)           BatchNorm2d affine params + running stats
    """
    N, C, H, W = x.shape

    # ---- Fold BN (eval mode) into the depthwise conv weights / bias --------
    scale = bn_gamma / jnp.sqrt(bn_var + eps)                   # (C,)
    w = conv_w[:, 0, :, :] * scale[:, None, None]               # (C, 3, 3)
    w_folded = jnp.transpose(w, (1, 2, 0)).reshape(9, 1, C)     # (9, 1, C)
    b_folded = (scale * conv_b + (bn_beta - bn_mean * scale)).reshape(1, 1, C)
    w_folded = w_folded.astype(jnp.float32)
    b_folded = b_folded.astype(jnp.float32)

    # ---- NCHW -> NHWC (channels on lanes) + zero halo of 1 for the stencil -
    x_nhwc = jnp.transpose(x, (0, 2, 3, 1))                     # (N, H, W, C)
    xp = jnp.pad(x_nhwc, ((0, 0), (1, 1), (1, 1), (0, 0)))      # (N, H+2, W+2, C)

    # Channel tiling: 128-lane tiles when C is a multiple of 128, else full C.
    ct = 128 if (C % 128 == 0) else C
    grid = (N, C // ct)

    out_nhwc = pl.pallas_call(
        _frelu_kernel,
        out_shape=jax.ShapeDtypeStruct((N, H, W, C), x.dtype),
        grid_spec=pltpu.PrefetchScalarGridSpec(
            num_scalar_prefetch=0,
            grid=grid,
            in_specs=[
                pl.BlockSpec((1, H + 2, W + 2, ct), lambda n, c: (n, 0, 0, c)),
                pl.BlockSpec((9, 1, ct), lambda n, c: (0, 0, c)),
                pl.BlockSpec((1, 1, ct), lambda n, c: (0, 0, c)),
            ],
            out_specs=pl.BlockSpec((1, H, W, ct), lambda n, c: (n, 0, 0, c)),
        ),
        compiler_params=pltpu.CompilerParams(
            dimension_semantics=("parallel", "parallel"),
        ),
    )(xp, w_folded, b_folded)

    return jnp.transpose(out_nhwc, (0, 3, 1, 2))                # back to NCHW


def _reference(x, conv_w, conv_b, bn_gamma, bn_beta, bn_mean, bn_var,
               eps: float = 1e-5):
    """Pure-JAX reference: max(x, BN(depthwise_conv3x3(x))) in eval mode."""
    N, C, H, W = x.shape
    y = jax.lax.conv_general_dilated(
        x, conv_w,
        window_strides=(1, 1),
        padding=((1, 1), (1, 1)),
        dimension_numbers=("NCHW", "OIHW", "NCHW"),
        feature_group_count=C,
    )
    y = y + conv_b[None, :, None, None]
    y = (y - bn_mean[None, :, None, None]) / jnp.sqrt(bn_var + eps)[None, :, None, None]
    y = y * bn_gamma[None, :, None, None] + bn_beta[None, :, None, None]
    return jnp.maximum(x, y)


if __name__ == "__main__":
    key = jax.random.PRNGKey(0)
    k1, k2, k3, k4, k5, k6, k7 = jax.random.split(key, 7)

    N, C, H, W = 2, 4, 16, 16                         # small NCHW feature map
    x = jax.random.normal(k1, (N, C, H, W), dtype=jnp.float32)
    conv_w = jax.random.normal(k2, (C, 1, 3, 3), dtype=jnp.float32) * 0.3
    conv_b = jax.random.normal(k3, (C,), dtype=jnp.float32) * 0.1
    bn_gamma = 1.0 + 0.1 * jax.random.normal(k4, (C,), dtype=jnp.float32)
    bn_beta = 0.1 * jax.random.normal(k5, (C,), dtype=jnp.float32)
    bn_mean = 0.1 * jax.random.normal(k6, (C,), dtype=jnp.float32)
    bn_var = jax.nn.softplus(jax.random.normal(k7, (C,), dtype=jnp.float32)) + 0.5

    y = frelu_pallas(x, conv_w, conv_b, bn_gamma, bn_beta, bn_mean, bn_var)
    y = jax.block_until_ready(y)

    y_ref = _reference(x, conv_w, conv_b, bn_gamma, bn_beta, bn_mean, bn_var)
    assert y.shape == x.shape and y.dtype == x.dtype
    assert jnp.allclose(y, y_ref, atol=1e-4, rtol=1e-4), "mismatch vs reference"

    print("KERNEL_OK")
</pallas_src>

<mosaic_0001>
module attributes {stable_mosaic.version = 11 : i64} {
  func.func @_frelu_kernel(%arg0: i32, %arg1: i32, %arg2: memref<1x18x18x4xf32, #tpu.memory_space<vmem>>, %arg3: memref<9x1x4xf32, #tpu.memory_space<vmem>>, %arg4: memref<1x1x4xf32, #tpu.memory_space<vmem>>, %arg5: memref<1x16x16x4xf32, #tpu.memory_space<vmem>>) attributes {dimension_semantics = [#tpu.dimension_semantics<parallel>, #tpu.dimension_semantics<parallel>], iteration_bounds = array<i64: 2, 1>, scalar_prefetch = 0 : i64, scratch_operands = 0 : i64, tpu.core_type = #tpu.core_type<tc>, window_params = [{transform_indices = @transform_0, window_bounds = array<i64: 1, 18, 18, 4>}, {transform_indices = @transform_1, window_bounds = array<i64: 9, 1, 4>}, {transform_indices = @transform_2, window_bounds = array<i64: 1, 1, 4>}, {transform_indices = @transform_3, window_bounds = array<i64: 1, 16, 16, 4>}]} {
    %c0 = arith.constant 0 : index
    %c0_0 = arith.constant 0 : index
    %c0_1 = arith.constant 0 : index
    %c0_2 = arith.constant 0 : index
    %0 = vector.load %arg2[%c0, %c0_0, %c0_1, %c0_2] : memref<1x18x18x4xf32, #tpu.memory_space<vmem>>, vector<1x16x16x4xf32>
    %1 = vector.shape_cast %0 : vector<1x16x16x4xf32> to vector<16x16x4xf32>
    %c0_3 = arith.constant 0 : index
    %c0_4 = arith.constant 0 : index
    %c0_5 = arith.constant 0 : index
    %2 = vector.load %arg3[%c0_3, %c0_4, %c0_5] : memref<9x1x4xf32, #tpu.memory_space<vmem>>, vector<1x1x4xf32>
    %3 = vector.shape_cast %2 : vector<1x1x4xf32> to vector<1x4xf32>
    %4 = vector.shape_cast %3 : vector<1x4xf32> to vector<1x1x4xf32>
    %5 = vector.broadcast %4 : vector<1x1x4xf32> to vector<16x16x4xf32>
    %6 = arith.mulf %1, %5 : vector<16x16x4xf32>
    %c0_6 = arith.constant 0 : index
    %c0_7 = arith.constant 0 : index
    %c1 = arith.constant 1 : index
    %c0_8 = arith.constant 0 : index
    %7 = vector.load %arg2[%c0_6, %c0_7, %c1, %c0_8] : memref<1x18x18x4xf32, #tpu.memory_space<vmem>>, vector<1x16x16x4xf32>
    %8 = vector.shape_cast %7 : vector<1x16x16x4xf32> to vector<16x16x4xf32>
    %c1_9 = arith.constant 1 : index
    %c0_10 = arith.constant 0 : index
    %c0_11 = arith.constant 0 : index
    %9 = vector.load %arg3[%c1_9, %c0_10, %c0_11] : memref<9x1x4xf32, #tpu.memory_space<vmem>>, vector<1x1x4xf32>
    %10 = vector.shape_cast %9 : vector<1x1x4xf32> to vector<1x4xf32>
    %11 = vector.shape_cast %10 : vector<1x4xf32> to vector<1x1x4xf32>
    %12 = vector.broadcast %11 : vector<1x1x4xf32> to vector<16x16x4xf32>
    %13 = arith.mulf %8, %12 : vector<16x16x4xf32>
    %14 = arith.addf %6, %13 : vector<16x16x4xf32>
    %c0_12 = arith.constant 0 : index
    %c0_13 = arith.constant 0 : index
    %c2 = arith.constant 2 : index
    %c0_14 = arith.constant 0 : index
    %15 = vector.load %arg2[%c0_12, %c0_13, %c2, %c0_14] : memref<1x18x18x4xf32, #tpu.memory_space<vmem>>, vector<1x16x16x4xf32>
    %16 = vector.shape_cast %15 : vector<1x16x16x4xf32> to vector<16x16x4xf32>
    %c2_15 = arith.constant 2 : index
    %c0_16 = arith.constant 0 : index
    %c0_17 = arith.constant 0 : index
    %17 = vector.load %arg3[%c2_15, %c0_16, %c0_17] : memref<9x1x4xf32, #tpu.memory_space<vmem>>, vector<1x1x4xf32>
    %18 = vector.shape_cast %17 : vector<1x1x4xf32> to vector<1x4xf32>
    %19 = vector.shape_cast %18 : vector<1x4xf32> to vector<1x1x4xf32>
    %20 = vector.broadcast %19 : vector<1x1x4xf32> to vector<16x16x4xf32>
    %21 = arith.mulf %16, %20 : vector<16x16x4xf32>
    %22 = arith.addf %14, %21 : vector<16x16x4xf32>
    %c0_18 = arith.constant 0 : index
    %c1_19 = arith.constant 1 : index
    %c0_20 = arith.constant 0 : index
    %c0_21 = arith.constant 0 : index
    %23 = vector.load %arg2[%c0_18, %c1_19, %c0_20, %c0_21] : memref<1x18x18x4xf32, #tpu.memory_space<vmem>>, vector<1x16x16x4xf32>
    %24 = vector.shape_cast %23 : vector<1x16x16x4xf32> to vector<16x16x4xf32>
    %c3 = arith.constant 3 : index
    %c0_22 = arith.constant 0 : index
    %c0_23 = arith.constant 0 : index
    %25 = vector.load %arg3[%c3, %c0_22, %c0_23] : memref<9x1x4xf32, #tpu.memory_space<vmem>>, vector<1x1x4xf32>
    %26 = vector.shape_cast %25 : vector<1x1x4xf32> to vector<1x4xf32>
    %27 = vector.shape_cast %26 : vector<1x4xf32> to vector<1x1x4xf32>
    %28 = vector.broadcast %27 : vector<1x1x4xf32> to vector<16x16x4xf32>
    %29 = arith.mulf %24, %28 : vector<16x16x4xf32>
    %30 = arith.addf %22, %29 : vector<16x16x4xf32>
    %c0_24 = arith.constant 0 : index
    %c1_25 = arith.constant 1 : index
    %c1_26 = arith.constant 1 : index
    %c0_27 = arith.constant 0 : index
    %31 = vector.load %arg2[%c0_24, %c1_25, %c1_26, %c0_27] : memref<1x18x18x4xf32, #tpu.memory_space<vmem>>, vector<1x16x16x4xf32>
    %32 = vector.shape_cast %31 : vector<1x16x16x4xf32> to vector<16x16x4xf32>
    %c4 = arith.constant 4 : index
    %c0_28 = arith.constant 0 : index
    %c0_29 = arith.constant 0 : index
    %33 = vector.load %arg3[%c4, %c0_28, %c0_29] : memref<9x1x4xf32, #tpu.memory_space<vmem>>, vector<1x1x4xf32>
    %34 = vector.shape_cast %33 : vector<1x1x4xf32> to vector<1x4xf32>
    %35 = vector.shape_cast %34 : vector<1x4xf32> to vector<1x1x4xf32>
    %36 = vector.broadcast %35 : vector<1x1x4xf32> to vector<16x16x4xf32>
    %37 = arith.mulf %32, %36 : vector<16x16x4xf32>
    %38 = arith.addf %30, %37 : vector<16x16x4xf32>
    %c0_30 = arith.constant 0 : index
    %c1_31 = arith.constant 1 : index
    %c2_32 = arith.constant 2 : index
    %c0_33 = arith.constant 0 : index
    %39 = vector.load %arg2[%c0_30, %c1_31, %c2_32, %c0_33] : memref<1x18x18x4xf32, #tpu.memory_space<vmem>>, vector<1x16x16x4xf32>
    %40 = vector.shape_cast %39 : vector<1x16x16x4xf32> to vector<16x16x4xf32>
    %c5 = arith.constant 5 : index
    %c0_34 = arith.constant 0 : index
    %c0_35 = arith.constant 0 : index
    %41 = vector.load %arg3[%c5, %c0_34, %c0_35] : memref<9x1x4xf32, #tpu.memory_space<vmem>>, vector<1x1x4xf32>
    %42 = vector.shape_cast %41 : vector<1x1x4xf32> to vector<1x4xf32>
    %43 = vector.shape_cast %42 : vector<1x4xf32> to vector<1x1x4xf32>
    %44 = vector.broadcast %43 : vector<1x1x4xf32> to vector<16x16x4xf32>
    %45 = arith.mulf %40, %44 : vector<16x16x4xf32>
    %46 = arith.addf %38, %45 : vector<16x16x4xf32>
    %c0_36 = arith.constant 0 : index
    %c2_37 = arith.constant 2 : index
    %c0_38 = arith.constant 0 : index
    %c0_39 = arith.constant 0 : index
    %47 = vector.load %arg2[%c0_36, %c2_37, %c0_38, %c0_39] : memref<1x18x18x4xf32, #tpu.memory_space<vmem>>, vector<1x16x16x4xf32>
    %48 = vector.shape_cast %47 : vector<1x16x16x4xf32> to vector<16x16x4xf32>
    %c6 = arith.constant 6 : index
    %c0_40 = arith.constant 0 : index
    %c0_41 = arith.constant 0 : index
    %49 = vector.load %arg3[%c6, %c0_40, %c0_41] : memref<9x1x4xf32, #tpu.memory_space<vmem>>, vector<1x1x4xf32>
    %50 = vector.shape_cast %49 : vector<1x1x4xf32> to vector<1x4xf32>
    %51 = vector.shape_cast %50 : vector<1x4xf32> to vector<1x1x4xf32>
    %52 = vector.broadcast %51 : vector<1x1x4xf32> to vector<16x16x4xf32>
    %53 = arith.mulf %48, %52 : vector<16x16x4xf32>
    %54 = arith.addf %46, %53 : vector<16x16x4xf32>
    %c0_42 = arith.constant 0 : index
    %c2_43 = arith.constant 2 : index
    %c1_44 = arith.constant 1 : index
    %c0_45 = arith.constant 0 : index
    %55 = vector.load %arg2[%c0_42, %c2_43, %c1_44, %c0_45] : memref<1x18x18x4xf32, #tpu.memory_space<vmem>>, vector<1x16x16x4xf32>
    %56 = vector.shape_cast %55 : vector<1x16x16x4xf32> to vector<16x16x4xf32>
    %c7 = arith.constant 7 : index
    %c0_46 = arith.constant 0 : index
    %c0_47 = arith.constant 0 : index
    %57 = vector.load %arg3[%c7, %c0_46, %c0_47] : memref<9x1x4xf32, #tpu.memory_space<vmem>>, vector<1x1x4xf32>
    %58 = vector.shape_cast %57 : vector<1x1x4xf32> to vector<1x4xf32>
    %59 = vector.shape_cast %58 : vector<1x4xf32> to vector<1x1x4xf32>
    %60 = vector.broadcast %59 : vector<1x1x4xf32> to vector<16x16x4xf32>
    %61 = arith.mulf %56, %60 : vector<16x16x4xf32>
    %62 = arith.addf %54, %61 : vector<16x16x4xf32>
    %c0_48 = arith.constant 0 : index
    %c2_49 = arith.constant 2 : index
    %c2_50 = arith.constant 2 : index
    %c0_51 = arith.constant 0 : index
    %63 = vector.load %arg2[%c0_48, %c2_49, %c2_50, %c0_51] : memref<1x18x18x4xf32, #tpu.memory_space<vmem>>, vector<1x16x16x4xf32>
    %64 = vector.shape_cast %63 : vector<1x16x16x4xf32> to vector<16x16x4xf32>
    %c8 = arith.constant 8 : index
    %c0_52 = arith.constant 0 : index
    %c0_53 = arith.constant 0 : index
    %65 = vector.load %arg3[%c8, %c0_52, %c0_53] : memref<9x1x4xf32, #tpu.memory_space<vmem>>, vector<1x1x4xf32>
    %66 = vector.shape_cast %65 : vector<1x1x4xf32> to vector<1x4xf32>
    %67 = vector.shape_cast %66 : vector<1x4xf32> to vector<1x1x4xf32>
    %68 = vector.broadcast %67 : vector<1x1x4xf32> to vector<16x16x4xf32>
    %69 = arith.mulf %64, %68 : vector<16x16x4xf32>
    %70 = arith.addf %62, %69 : vector<16x16x4xf32>
    %c0_54 = arith.constant 0 : index
    %c0_55 = arith.constant 0 : index
    %c0_56 = arith.constant 0 : index
    %71 = vector.load %arg4[%c0_54, %c0_55, %c0_56] : memref<1x1x4xf32, #tpu.memory_space<vmem>>, vector<1x1x4xf32>
    %72 = vector.shape_cast %71 : vector<1x1x4xf32> to vector<1x4xf32>
    %73 = vector.shape_cast %72 : vector<1x4xf32> to vector<1x1x4xf32>
    %74 = vector.broadcast %73 : vector<1x1x4xf32> to vector<16x16x4xf32>
    %75 = arith.addf %70, %74 : vector<16x16x4xf32>
    %c0_57 = arith.constant 0 : index
    %c1_58 = arith.constant 1 : index
    %c1_59 = arith.constant 1 : index
    %c0_60 = arith.constant 0 : index
    %76 = vector.load %arg2[%c0_57, %c1_58, %c1_59, %c0_60] : memref<1x18x18x4xf32, #tpu.memory_space<vmem>>, vector<1x16x16x4xf32>
    %77 = vector.shape_cast %76 : vector<1x16x16x4xf32> to vector<16x16x4xf32>
    %78 = arith.maximumf %77, %75 : vector<16x16x4xf32>
    %c0_61 = arith.constant 0 : index
    %c0_62 = arith.constant 0 : index
    %c0_63 = arith.constant 0 : index
    %c0_64 = arith.constant 0 : index
    %79 = vector.load %arg5[%c0_61, %c0_62, %c0_63, %c0_64] : memref<1x16x16x4xf32, #tpu.memory_space<vmem>>, vector<1x16x16x4xf32>
    %80 = vector.shape_cast %79 : vector<1x16x16x4xf32> to vector<16x16x4xf32>
    %81 = vector.shape_cast %78 : vector<16x16x4xf32> to vector<1x16x16x4xf32>
    tpu.vector_store %arg5[%c0_61, %c0_62, %c0_63, %c0_64], %81 {strides = array<i32>} : memref<1x16x16x4xf32, #tpu.memory_space<vmem>>, vector<1x16x16x4xf32>,
    return
  }
  func.func @transform_0(%arg0: i32, %arg1: i32) -> (i32, i32, i32, i32) {
    %c0_i32 = arith.constant 0 : i32
    %c0_i32_0 = arith.constant 0 : i32
    %c0_i32_1 = arith.constant 0 : i32
    return %arg0, %c0_i32, %c0_i32_0, %arg1 : i32, i32, i32, i32
  }
  func.func @transform_1(%arg0: i32, %arg1: i32) -> (i32, i32, i32) {
    %c0_i32 = arith.constant 0 : i32
    %c0_i32_0 = arith.constant 0 : i32
    %c0_i32_1 = arith.constant 0 : i32
    return %c0_i32, %c0_i32_0, %arg1 : i32, i32, i32
  }
  func.func @transform_2(%arg0: i32, %arg1: i32) -> (i32, i32, i32) {
    %c0_i32 = arith.constant 0 : i32
    %c0_i32_0 = arith.constant 0 : i32
    %c0_i32_1 = arith.constant 0 : i32
    return %c0_i32, %c0_i32_0, %arg1 : i32, i32, i32
  }
  func.func @transform_3(%arg0: i32, %arg1: i32) -> (i32, i32, i32, i32) {
    %c0_i32 = arith.constant 0 : i32
    %c0_i32_0 = arith.constant 0 : i32
    %c0_i32_1 = arith.constant 0 : i32
    return %arg0, %c0_i32, %c0_i32_0, %arg1 : i32, i32, i32, i32
  }
}

</mosaic_0001>

<bundles_post_ra>
// kernel: tpu_custom_call.1
= control target key start
LH: loop header
LB: loop body
LE: loop exit
PB: predicated region body
PF: predicated region fallthrough
CT: control target
= control target key end

     0   :  { %s1619_s12 = smov 0   ;;  %s1621_s13 = smov 0   ;;  %s2553_s0 = inlined_call_operand.vmem [shape: f32[2,18,18,4], index: 0, kind: input, shape index: {}]   ;;  %s2554_s1 = inlined_call_operand.vmem [shape: f32[9,1,4], index: 1, kind: input, shape index: {}]   ;;  %s2555_s2 = inlined_call_operand.vmem [shape: f32[1,1,4], index: 2, kind: input, shape index: {}]   ;;  %s2556_s3 = inlined_call_operand.vmem [shape: f32[2,16,16,4], index: 3, kind: output, shape index: {}]  }
   0x1   :  { %s1623_s14 = smov 0  }
   0x2 LB: > { %s25_s15 = sadd.s32 1, %s1593_s13  ;;  %p1323_p0 = scmp.ge.s32.totalorder %s1597_s14, 1  ;;  %s1597_s14 = sphi %s1623_s14, %s13_s14   ;;  %s1593_s13 = sphi %s1621_s13, %s2558_s13   ;;  %s1589_s12 = sphi %s1619_s12, %s2557_s12  }
   0x3   : > { %p27_p1 = scmp.ge.s32.totalorder %s25_s15, 2  ;;  %p172_p2 = scmp.lt.s32.totalorder %s1597_s14, 3 }
   0x5   : > { %s2560_s15 = smov (%p27_p1, %s25_s15), 0  ;;  %p173_p3 = pnand %p1323_p0, %p172_p2 }
   0x6   : > { %p208_p4 = scmp.lt.s32.totalorder (!%p173_p3), %s1589_s12, 1 }
   0x7   : > { %176 = sbr.rel (%p173_p3) target bundleno = 181 (0xb5), region = 32 }
   0xc   : > { %s2562_s12 = smov (!%p208_p4, %s1589_s12), 1  ;;  %v1642_v0 = vld [vmem:[%s2554_s1] ss:$0 sm:$0xff]  ;;  %v1647_v1 = vld [vmem:[%s2554_s1 + $0x1] ss:$0 sm:$0xff]  ;;  %vm1176_vm0 = vcmask 31744  }
   0xd   : > { %v1652_v2 = vld [vmem:[%s2554_s1 + $0x2] ss:$0 sm:$0xff]  ;;  %v1657_v3 = vld [vmem:[%s2554_s1 + $0x3] ss:$0 sm:$0xff]  ;;  %s1530_s24 = smul.u32 432, %s2562_s12  ;;  %s1529_s17 = sshll.u32 %s2562_s12, 8 }
   0xe   : > { %v1663_v4 = vld [vmem:[%s2554_s1 + $0x4] ss:$0 sm:$0xff]  ;;  %v1668_v5 = vld [vmem:[%s2554_s1 + $0x5] ss:$0 sm:$0xff]  ;;  %v1673_v6 = vld [vmem:[%s2554_s1 + $0x6] ss:$0 sm:$0xff]  ;;  %s1826_s19 = scalar_lea.vmem %s2556_s3, %s1529_s17 }
   0xf   : > { %s1678_s6 = scalar_lea.vmem %s2553_s0, %s1530_s24  ;;  %v1683_v7 = vld [vmem:[%s2554_s1 + $0x7] ss:$0 sm:$0xff]  ;;  %v1688_v8 = vld [vmem:[%s2554_s1 + $0x8] ss:$0 sm:$0xff] }
  0x10   : > { %v230_v9 = vld [vmem:[%s1678_s6] sm:$0xff]  ;;  %v1329_v15 = vld [vmem:[%s1678_s6 + $0x18] sm:$0xff]  ;;  %v1703_v19 = vld [vmem:[%s1678_s6 + $0x30] sm:$0xff] }
  0x11   : > { %v298_v10 = vld [vmem:[%s1678_s6 + $0x1] sm:$0xff]  ;;  %v266_v12 = vmul.f32 %v1642_v0, %v230_v9  ;;  %v1698_v16 = vld [vmem:[%s1678_s6 + $0x19] sm:$0xff]  ;;  %v538_v18 = vmul.f32 %v1657_v3, %v1329_v15  ;;  %v268_v20 = vmul.f32 %v1642_v0, %v1329_v15  ;;  %v842_v24 = vmul.f32 %v1673_v6, %v1703_v19  ;;  %v1712_v25 = vld [vmem:[%s1678_s6 + $0x31] sm:$0xff] }
  0x12   : > { %v399_v11 = vld [vmem:[%s1678_s6 + $0x2] sm:$0xff]  ;;  %v335_v13 = vmul.f32 %v1647_v1, %v298_v10  ;;  %v1395_v17 = vld [vmem:[%s1678_s6 + $0x1a] sm:$0xff]  ;;  %v639_v22 = vmul.f32 %v1663_v4, %v1698_v16  ;;  %v943_v27 = vmul.f32 %v1683_v7, %v1712_v25  ;;  %v1494_v28 = vld [vmem:[%s1678_s6 + $0x32] sm:$0xff]  ;;  %v337_v32 = vmul.f32 %v1647_v1, %v1698_v16 }
  0x13   : > { %v436_v14 = vmul.f32 %v1652_v2, %v399_v11  ;;  %v740_v23 = vmul.f32 %v1668_v5, %v1395_v17  ;;  %v231_v26 = vld [vmem:[%s1678_s6 + $0x8] sm:$0xff]  ;;  %v438_v33 = vmul.f32 %v1652_v2, %v1395_v17  ;;  %v1044_v35 = vmul.f32 %v1688_v8, %v1494_v28  ;;  %v1330_v38 = vld [vmem:[%s1678_s6 + $0x20] sm:$0xff]  ;;  %v1736_v43 = vld [vmem:[%s1678_s6 + $0x38] sm:$0xff] }
  0x14   : > { %v367_v21 = vadd.f32 %v335_v13, %v266_v12  ;;  %v267_v29 = vmul.f32 %v1642_v0, %v231_v26  ;;  %v299_v30 = vld [vmem:[%s1678_s6 + $0x9] sm:$0xff]  ;;  %v1729_v39 = vld [vmem:[%s1678_s6 + $0x21] sm:$0xff]  ;;  %v539_v40 = vmul.f32 %v1657_v3, %v1330_v38  ;;  %v369_v44 = vadd.f32 %v337_v32, %v268_v20  ;;  %v1744_v50 = vld [vmem:[%s1678_s6 + $0x39] sm:$0xff] }
  0x15   : > { %v400_v31 = vld [vmem:[%s1678_s6 + $0xa] sm:$0xff]  ;;  %v336_v36 = vmul.f32 %v1647_v1, %v299_v30  ;;  %v640_v41 = vmul.f32 %v1663_v4, %v1729_v39  ;;  %v1396_v42 = vld [vmem:[%s1678_s6 + $0x22] sm:$0xff]  ;;  %v540_v45 = vmul.f32 %v1657_v3, %v1703_v19  ;;  %v843_v49 = vmul.f32 %v1673_v6, %v1736_v43  ;;  %v1747_v51 = vld [vmem:[%s1678_s6 + $0x3a] sm:$0xff] }
  0x16   : > { %v468_v34 = vadd.f32 %v436_v14, %v367_v21  ;;  %v437_v37 = vmul.f32 %v1652_v2, %v400_v31  ;;  %v741_v48 = vmul.f32 %v1668_v5, %v1396_v42  ;;  %v944_v52 = vmul.f32 %v1683_v7, %v1744_v50  ;;  %v1758_v56 = vld [vmem:[%s1678_s6 + $0x48] sm:$0xff] }
  0x17   : > { %v368_v47 = vadd.f32 %v336_v36, %v267_v29  ;;  %v1753_v53 = vmul.f32 %v1688_v8, %v1747_v51  ;;  %v470_v54 = vadd.f32 %v438_v33, %v369_v44  ;;  %v641_v55 = vmul.f32 %v1663_v4, %v1712_v25  ;;  %v1764_v62 = vld [vmem:[%s1678_s6 + $0x49] sm:$0xff]  ;;  %v1789_v33 = vld [vmem:[%s1678_s6 + $0x51] sm:$0xff] }
  0x18   : > { %v570_v46 = vadd.f32 %v538_v18, %v468_v34  ;;  %v742_v59 = vmul.f32 %v1668_v5, %v1494_v28  ;;  %v844_v60 = vmul.f32 %v1673_v6, %v1758_v56  ;;  %v1767_v63 = vld [vmem:[%s1678_s6 + $0x4a] sm:$0xff]  ;;  %v269_v9 = vmul.f32 %v1642_v0, %v1330_v38 }
  0x19   : > { %v469_v58 = vadd.f32 %v437_v37, %v368_v47  ;;  %v572_v61 = vadd.f32 %v540_v45, %v470_v54  ;;  %v338_v10 = vmul.f32 %v1647_v1, %v1729_v39  ;;  %v439_v11 = vmul.f32 %v1652_v2, %v1396_v42  ;;  %v1798_v37 = vld [vmem:[%s2555_s2] ss:$0 sm:$0xff]  ;;  %v1804_v45 = vld [vmem:[%s1678_s6 + $0x52] sm:$0xff] }
  0x1a   : > { %v671_v57 = vadd.f32 %v639_v22, %v570_v46  ;;  %v945_v14 = vmul.f32 %v1683_v7, %v1764_v62  ;;  %v1046_v15 = vmul.f32 %v1688_v8, %v1767_v63  ;;  %v541_v20 = vmul.f32 %v1657_v3, %v1736_v43  ;;  %v1782_v22 = vld [vmem:[%s1678_s6 + $0x50] sm:$0xff] }
  0x1b   : > { %v571_v13 = vadd.f32 %v539_v40, %v469_v58  ;;  %v673_v17 = vadd.f32 %v641_v55, %v572_v61  ;;  %v370_v18 = vadd.f32 %v338_v10, %v269_v9  ;;  %v642_v21 = vmul.f32 %v1663_v4, %v1744_v50 }
  0x1c   : > { %v772_v12 = vadd.f32 %v740_v23, %v671_v57  ;;  %v743_v29 = vmul.f32 %v1668_v5, %v1747_v51  ;;  %v845_v30 = vmul.f32 %v1673_v6, %v1782_v22  ;;  %v270_v34 = vmul.f32 %v1642_v0, %v1703_v19 }
  0x1d   : > { %v672_v26 = vadd.f32 %v640_v41, %v571_v13  ;;  %v774_v31 = vadd.f32 %v742_v59, %v673_v17  ;;  %v471_v32 = vadd.f32 %v439_v11, %v370_v18  ;;  %v339_v36 = vmul.f32 %v1647_v1, %v1712_v25  ;;  %v1816_v59 = vld [vmem:[%s1678_s6 + $0x60] sm:$0xff] }
  0x1e   : > { %v874_v23 = vadd.f32 %v842_v24, %v772_v12  ;;  %v946_v40 = vmul.f32 %v1683_v7, %v1789_v33  ;;  %v440_v41 = vmul.f32 %v1652_v2, %v1494_v28  ;;  %v643_v54 = vmul.f32 %v1663_v4, %v1764_v62 }
  0x1f   : > { %v773_v38 = vadd.f32 %v741_v48, %v672_v26  ;;  %v876_v42 = vadd.f32 %v844_v60, %v774_v31  ;;  %v573_v44 = vadd.f32 %v541_v20, %v471_v32  ;;  %v371_v19 = vadd.f32 %v339_v36, %v270_v34  ;;  %v1838_v20 = vld [vmem:[%s1678_s6 + $0x61] sm:$0xff] }
  0x20   : > { %v975_v24 = vadd.f32 %v943_v27, %v874_v23  ;;  %v542_v27 = vmul.f32 %v1657_v3, %v1758_v56  ;;  %v1047_v48 = vmul.f32 %v1688_v8, %v1804_v45  ;;  %v744_v58 = vmul.f32 %v1668_v5, %v1767_v63 }
  0x21   : > { %v875_v47 = vadd.f32 %v843_v49, %v773_v38  ;;  %v977_v55 = vadd.f32 %v945_v14, %v876_v42  ;;  %v674_v57 = vadd.f32 %v642_v21, %v573_v44  ;;  %v472_v28 = vadd.f32 %v440_v41, %v371_v19  ;;  %v1433_v41 = vld [vmem:[%s1678_s6 + $0x68] sm:$0xff] }
  0x22   : > { %v1076_v46 = vadd.f32 %v1044_v35, %v975_v24  ;;  %v846_v35 = vmul.f32 %v1673_v6, %v1816_v59  ;;  %v271_v49 = vmul.f32 %v1642_v0, %v1736_v43  ;;  %v340_v12 = vmul.f32 %v1647_v1, %v1744_v50 }
  0x23   : > { %v976_v61 = vadd.f32 %v944_v52, %v875_v47  ;;  %v1078_v9 = vadd.f32 %v1046_v15, %v977_v55  ;;  %v775_v10 = vadd.f32 %v743_v29, %v674_v57  ;;  %v574_v11 = vadd.f32 %v542_v27, %v472_v28  ;;  %v1869_v47 = vld [vmem:[%s1678_s6 + $0x69] sm:$0xff] }
  0x24   : > { %v1112_v60 = vadd.f32 %v1798_v37, %v1076_v46  ;;  %v441_v43 = vmul.f32 %v1652_v2, %v1747_v51  ;;  %v543_v14 = vmul.f32 %v1657_v3, %v1782_v22  ;;  %v372_v21 = vadd.f32 %v340_v12, %v271_v49  ;;  %v1881_v49 = vld [vmem:[%s1678_s6 + $0x78] sm:$0xff] }
  0x25   : > { %v1077_v13 = vadd.f32 %v1753_v53, %v976_v61  ;;  %v1114_v17 = vadd.f32 %v1798_v37, %v1078_v9  ;;  %v877_v18 = vadd.f32 %v845_v30, %v775_v10  ;;  %v675_v15 = vadd.f32 %v643_v54, %v574_v11  ;;  %v1498_v30 = vld [vmem:[%s1678_s6 + $0x62] sm:$0xff]  ;;  %v1887_v11 = vld [vmem:[%s1678_s6 + $0x79] sm:$0xff] }
  0x26   : > { %v1144_v52 = vmax.f32 %v1698_v16, %v1112_v60  ;;  %v947_v53 = vmul.f32 %v1683_v7, %v1838_v20  ;;  %v644_v51 = vmul.f32 %v1663_v4, %v1789_v33  ;;  %v473_v31 = vadd.f32 %v441_v43, %v372_v21 }
  0x27   : > { %v1113_v16 = vadd.f32 %v1798_v37, %v1077_v13  ;;  %v1146_v23 = vmax.f32 %v1712_v25, %v1114_v17  ;;  %v978_v26 = vadd.f32 %v946_v40, %v877_v18  ;;  %v776_v29 = vadd.f32 %v744_v58, %v675_v15 }
  0x28   : > { %1177 = vst.msk [vmem:[%s1826_s19] sm:$0xff] %vm1176_vm0, %v1144_v52  ;;  %v1048_v34 = vmul.f32 %v1688_v8, %v1498_v30  ;;  %v745_v36 = vmul.f32 %v1668_v5, %v1804_v45  ;;  %v272_v24 = vmul.f32 %v1642_v0, %v1758_v56  ;;  %v575_v40 = vadd.f32 %v543_v14, %v473_v31  ;;  %v1500_v14 = vld [vmem:[%s1678_s6 + $0x7a] sm:$0xff] }
  0x29   : > { %v1145_v32 = vmax.f32 %v1729_v39, %v1113_v16  ;;  %1179 = vst.msk [vmem:[%s1826_s19 + $0x10] sm:$0xff] %vm1176_vm0, %v1146_v23  ;;  %v1079_v38 = vadd.f32 %v1047_v48, %v978_v26  ;;  %v878_v25 = vadd.f32 %v846_v35, %v776_v29  ;;  %v341_v42 = vmul.f32 %v1647_v1, %v1764_v62  ;;  %v1499_v48 = vld [vmem:[%s1678_s6 + $0x6a] sm:$0xff]  ;;  %v1908_v29 = vld [vmem:[%s1678_s6 + $0x80] sm:$0xff] }
  0x2a   : > { %v847_v39 = vmul.f32 %v1673_v6, %v1433_v41  ;;  %v442_v44 = vmul.f32 %v1652_v2, %v1767_v63  ;;  %v544_v56 = vmul.f32 %v1657_v3, %v1816_v59  ;;  %v676_v46 = vadd.f32 %v644_v51, %v575_v40  ;;  %v1911_v31 = vld [vmem:[%s1678_s6 + $0x81] sm:$0xff] }
  0x2b   : > { %1178 = vst.msk [vmem:[%s1826_s19 + $0x8] sm:$0xff] %vm1176_vm0, %v1145_v32  ;;  %v1115_v19 = vadd.f32 %v1798_v37, %v1079_v38  ;;  %v979_v27 = vadd.f32 %v947_v53, %v878_v25  ;;  %v373_v54 = vadd.f32 %v341_v42, %v272_v24  ;;  %v948_v55 = vmul.f32 %v1683_v7, %v1869_v47  ;;  %v1501_v38 = vld [vmem:[%s1678_s6 + $0x82] sm:$0xff] }
  0x2c   : > { %v1049_v57 = vmul.f32 %v1688_v8, %v1499_v48  ;;  %v645_v63 = vmul.f32 %v1663_v4, %v1838_v20  ;;  %v273_v28 = vmul.f32 %v1642_v0, %v1782_v22  ;;  %v777_v61 = vadd.f32 %v745_v36, %v676_v46 }
  0x2d   : > { %v1147_v58 = vmax.f32 %v1744_v50, %v1115_v19  ;;  %v1080_v60 = vadd.f32 %v1048_v34, %v979_v27  ;;  %v474_v35 = vadd.f32 %v442_v44, %v373_v54  ;;  %v746_v9 = vmul.f32 %v1668_v5, %v1498_v30  ;;  %v1931_v54 = vld [vmem:[%s1678_s6 + $0x90] sm:$0xff] }
  0x2e   : > { %v848_v10 = vmul.f32 %v1673_v6, %v1881_v49  ;;  %v342_v12 = vmul.f32 %v1647_v1, %v1789_v33  ;;  %v443_v22 = vmul.f32 %v1652_v2, %v1804_v45  ;;  %v879_v52 = vadd.f32 %v847_v39, %v777_v61 }
  0x2f   : > { %1180 = vst.msk [vmem:[%s1826_s19 + $0x18] sm:$0xff] %vm1176_vm0, %v1147_v58  ;;  %v1116_v50 = vadd.f32 %v1798_v37, %v1080_v60  ;;  %v576_v13 = vadd.f32 %v544_v56, %v474_v35  ;;  %v949_v43 = vmul.f32 %v1683_v7, %v1887_v11  ;;  %v1050_v17 = vmul.f32 %v1688_v8, %v1500_v14  ;;  %v1941_v35 = vld [vmem:[%s1678_s6 + $0x91] sm:$0xff] }
  0x30   : > { %v374_v18 = vadd.f32 %v342_v12, %v273_v28  ;;  %v545_v15 = vmul.f32 %v1657_v3, %v1433_v41  ;;  %v646_v45 = vmul.f32 %v1663_v4, %v1869_v47  ;;  %v980_v16 = vadd.f32 %v948_v55, %v879_v52 }
  0x31   : > { %v1148_v21 = vmax.f32 %v1764_v62, %v1116_v50  ;;  %v677_v53 = vadd.f32 %v645_v63, %v576_v13  ;;  %v274_v51 = vmul.f32 %v1642_v0, %v1816_v59  ;;  %v747_v26 = vmul.f32 %v1668_v5, %v1499_v48 }
  0x32   : > { %v475_v23 = vadd.f32 %v443_v22, %v374_v18  ;;  %v343_v32 = vmul.f32 %v1647_v1, %v1838_v20  ;;  %v444_v34 = vmul.f32 %v1652_v2, %v1498_v30  ;;  %v1081_v62 = vadd.f32 %v1049_v57, %v980_v16 }
  0x33   : > { %1181 = vst.msk [vmem:[%s1826_s19 + $0x20] sm:$0xff] %vm1176_vm0, %v1148_v21  ;;  %v778_v36 = vadd.f32 %v746_v9, %v677_v53  ;;  %v849_v59 = vmul.f32 %v1673_v6, %v1908_v29  ;;  %v950_v24 = vmul.f32 %v1683_v7, %v1911_v31  ;;  %v1051_v40 = vmul.f32 %v1688_v8, %v1501_v38  ;;  %v1944_v9 = vld [vmem:[%s1678_s6 + $0x92] sm:$0xff] }
  0x34   : > { %v577_v25 = vadd.f32 %v545_v15, %v475_v23  ;;  %v375_v42 = vadd.f32 %v343_v32, %v274_v51  ;;  %v546_v39 = vmul.f32 %v1657_v3, %v1881_v49  ;;  %v1117_v30 = vadd.f32 %v1798_v37, %v1081_v62  ;;  %v1969_v32 = vld [vmem:[%s1678_s6 + $0x99] sm:$0xff] }
  0x35   : > { %v880_v44 = vadd.f32 %v848_v10, %v778_v36  ;;  %v647_v56 = vmul.f32 %v1663_v4, %v1887_v11  ;;  %v275_v19 = vmul.f32 %v1642_v0, %v1433_v41  ;;  %v344_v55 = vmul.f32 %v1647_v1, %v1869_v47  ;;  %v1975_v62 = vld [vmem:[%s1678_s6 + $0x9a] sm:$0xff] }
  0x36   : > { %v678_v27 = vadd.f32 %v646_v45, %v577_v25  ;;  %v476_v46 = vadd.f32 %v444_v34, %v375_v42  ;;  %v445_v57 = vmul.f32 %v1652_v2, %v1499_v48  ;;  %v1149_v63 = vmax.f32 %v1789_v33, %v1117_v30  ;;  %v1961_v45 = vld [vmem:[%s1678_s6 + $0x98] sm:$0xff] }
  0x37   : > { %v981_v28 = vadd.f32 %v949_v43, %v880_v44  ;;  %v748_v58 = vmul.f32 %v1668_v5, %v1500_v14  ;;  %v850_v60 = vmul.f32 %v1673_v6, %v1931_v54  ;;  %v376_v10 = vadd.f32 %v344_v55, %v275_v19 }
  0x38   : > { %v779_v61 = vadd.f32 %v747_v26, %v678_v27  ;;  %v578_v41 = vadd.f32 %v546_v39, %v476_v46  ;;  %v547_v12 = vmul.f32 %v1657_v3, %v1908_v29  ;;  %1182 = vst.msk [vmem:[%s1826_s19 + $0x28] sm:$0xff] %vm1176_vm0, %v1149_v63  ;;  %v951_v48 = vmul.f32 %v1683_v7, %v1941_v35 }
  0x39   : > { %v1082_v33 = vadd.f32 %v1050_v17, %v981_v28  ;;  %v1052_v22 = vmul.f32 %v1688_v8, %v1944_v9  ;;  %v648_v50 = vmul.f32 %v1663_v4, %v1911_v31  ;;  %v477_v43 = vadd.f32 %v445_v57, %v376_v10  ;;  %v1994_v57 = vld [vmem:[%s1678_s6 + $0xa8] sm:$0xff] }
  0x3a   : > { %v881_v52 = vadd.f32 %v849_v59, %v779_v61  ;;  %v679_v13 = vadd.f32 %v647_v56, %v578_v41  ;;  %v276_v18 = vmul.f32 %v1642_v0, %v1881_v49  ;;  %v749_v17 = vmul.f32 %v1668_v5, %v1501_v38 }
  0x3b   : > { %v1118_v15 = vadd.f32 %v1798_v37, %v1082_v33  ;;  %v345_v21 = vmul.f32 %v1647_v1, %v1887_v11  ;;  %v446_v16 = vmul.f32 %v1652_v2, %v1500_v14  ;;  %v579_v23 = vadd.f32 %v547_v12, %v477_v43 }
  0x3c   : > { %v982_v53 = vadd.f32 %v950_v24, %v881_v52  ;;  %v780_v51 = vadd.f32 %v748_v58, %v679_v13  ;;  %v851_v26 = vmul.f32 %v1673_v6, %v1961_v45  ;;  %v952_v34 = vmul.f32 %v1683_v7, %v1969_v32  ;;  %v1504_v13 = vld [vmem:[%s1678_s6 + $0xaa] sm:$0xff] }
  0x3d   : > { %v1150_v49 = vmax.f32 %v1838_v20, %v1118_v15  ;;  %v377_v36 = vadd.f32 %v345_v21, %v276_v18  ;;  %v548_v59 = vmul.f32 %v1657_v3, %v1931_v54  ;;  %v680_v25 = vadd.f32 %v648_v50, %v579_v23  ;;  %v2017_v18 = vld [vmem:[%s1678_s6 + $0xb0] sm:$0xff] }
  0x3e   : > { %v1083_v14 = vadd.f32 %v1051_v40, %v982_v53  ;;  %v882_v24 = vadd.f32 %v850_v60, %v780_v51  ;;  %v1053_v42 = vmul.f32 %v1688_v8, %v1975_v62  ;;  %v649_v20 = vmul.f32 %v1663_v4, %v1941_v35 }
  0x3f   : > { %1183 = vst.msk [vmem:[%s1826_s19 + $0x30] sm:$0xff] %vm1176_vm0, %v1150_v49  ;;  %v478_v39 = vadd.f32 %v446_v16, %v377_v36  ;;  %v277_v30 = vmul.f32 %v1642_v0, %v1908_v29  ;;  %v346_v44 = vmul.f32 %v1647_v1, %v1911_v31  ;;  %v781_v19 = vadd.f32 %v749_v17, %v680_v25  ;;  %v1505_v49 = vld [vmem:[%s1678_s6 + $0xb2] sm:$0xff] }
  0x40   : > { %v1119_v40 = vadd.f32 %v1798_v37, %v1083_v14  ;;  %v983_v56 = vadd.f32 %v951_v48, %v882_v24  ;;  %v447_v27 = vmul.f32 %v1652_v2, %v1501_v38  ;;  %v750_v55 = vmul.f32 %v1668_v5, %v1944_v9  ;;  %v2002_v38 = vld [vmem:[%s1678_s6 + $0xa9] sm:$0xff] }
  0x41   : > { %v580_v46 = vadd.f32 %v548_v59, %v478_v39  ;;  %v378_v63 = vadd.f32 %v346_v44, %v277_v30  ;;  %v549_v29 = vmul.f32 %v1657_v3, %v1961_v45  ;;  %v883_v60 = vadd.f32 %v851_v26, %v781_v19  ;;  %v2028_v26 = vld [vmem:[%s1678_s6 + $0xb1] sm:$0xff]  ;;  %v2046_v44 = vld [vmem:[%s1678_s6 + $0xc0] sm:$0xff] }
  0x42   : > { %v1151_v28 = vmax.f32 %v1869_v47, %v1119_v40  ;;  %v1084_v58 = vadd.f32 %v1052_v22, %v983_v56  ;;  %v852_v61 = vmul.f32 %v1673_v6, %v1994_v57  ;;  %v953_v10 = vmul.f32 %v1683_v7, %v2002_v38 }
  0x43   : > { %v681_v41 = vadd.f32 %v649_v20, %v580_v46  ;;  %v479_v12 = vadd.f32 %v447_v27, %v378_v63  ;;  %v650_v33 = vmul.f32 %v1663_v4, %v1969_v32  ;;  %v984_v48 = vadd.f32 %v952_v34, %v883_v60  ;;  %v2055_v63 = vld [vmem:[%s1678_s6 + $0xc1] sm:$0xff] }
  0x44   : > { %1184 = vst.msk [vmem:[%s1826_s19 + $0x38] sm:$0xff] %vm1176_vm0, %v1151_v28  ;;  %v1120_v47 = vadd.f32 %v1798_v37, %v1084_v58  ;;  %v751_v22 = vmul.f32 %v1668_v5, %v1975_v62  ;;  %v278_v50 = vmul.f32 %v1642_v0, %v1931_v54  ;;  %v347_v15 = vmul.f32 %v1647_v1, %v1941_v35 }
  0x45   : > { %v782_v52 = vadd.f32 %v750_v55, %v681_v41  ;;  %v581_v43 = vadd.f32 %v549_v29, %v479_v12  ;;  %v448_v17 = vmul.f32 %v1652_v2, %v1944_v9  ;;  %v1085_v16 = vadd.f32 %v1053_v42, %v984_v48 }
  0x46   : > { %v1152_v21 = vmax.f32 %v1887_v11, %v1120_v47  ;;  %v1054_v53 = vmul.f32 %v1688_v8, %v1504_v13  ;;  %v853_v54 = vmul.f32 %v1673_v6, %v2017_v18  ;;  %v379_v34 = vadd.f32 %v347_v15, %v278_v50 }
  0x47   : > { %v884_v51 = vadd.f32 %v852_v61, %v782_v52  ;;  %v682_v23 = vadd.f32 %v650_v33, %v581_v43  ;;  %v550_v36 = vmul.f32 %v1657_v3, %v1994_v57  ;;  %v1121_v11 = vadd.f32 %v1798_v37, %v1085_v16  ;;  %v1441_v43 = vld [vmem:[%s1678_s6 + $0xc8] sm:$0xff] }
  0x48   : > { %1185 = vst.msk [vmem:[%s1826_s19 + $0x40] sm:$0xff] %vm1176_vm0, %v1152_v21  ;;  %v954_v9 = vmul.f32 %v1683_v7, %v2028_v26  ;;  %v1055_v59 = vmul.f32 %v1688_v8, %v1505_v49  ;;  %v651_v14 = vmul.f32 %v1663_v4, %v2002_v38  ;;  %v480_v42 = vadd.f32 %v448_v17, %v379_v34  ;;  %v2078_v21 = vld [vmem:[%s1678_s6 + $0xc9] sm:$0xff] }
  0x49   : > { %v985_v24 = vadd.f32 %v953_v10, %v884_v51  ;;  %v783_v25 = vadd.f32 %v751_v22, %v682_v23  ;;  %v279_v39 = vmul.f32 %v1642_v0, %v1961_v45  ;;  %v1153_v20 = vmax.f32 %v1911_v31, %v1121_v11  ;;  %v1506_v45 = vld [vmem:[%s1678_s6 + $0xc2] sm:$0xff]  ;;  %v2081_v16 = vld [vmem:[%s1678_s6 + $0xca] sm:$0xff] }
  0x4a   : > { %v752_v30 = vmul.f32 %v1668_v5, %v1504_v13  ;;  %v348_v40 = vmul.f32 %v1647_v1, %v1969_v32  ;;  %v449_v56 = vmul.f32 %v1652_v2, %v1975_v62  ;;  %v582_v46 = vadd.f32 %v550_v36, %v480_v42 }
  0x4b   : > { %v1086_v19 = vadd.f32 %v1054_v53, %v985_v24  ;;  %v885_v27 = vadd.f32 %v853_v54, %v783_v25  ;;  %v854_v55 = vmul.f32 %v1673_v6, %v2046_v44  ;;  %1186 = vst.msk [vmem:[%s1826_s19 + $0x48] sm:$0xff] %vm1176_vm0, %v1153_v20  ;;  %v955_v31 = vmul.f32 %v1683_v7, %v2055_v63 }
  0x4c   : > { %v1056_v29 = vmul.f32 %v1688_v8, %v1506_v45  ;;  %v380_v28 = vadd.f32 %v348_v40, %v279_v39  ;;  %v551_v62 = vmul.f32 %v1657_v3, %v2017_v18  ;;  %v683_v61 = vadd.f32 %v651_v14, %v582_v46  ;;  %v2098_v14 = vld [vmem:[%s1678_s6 + $0xd8] sm:$0xff] }
  0x4d   : > { %v1122_v58 = vadd.f32 %v1798_v37, %v1086_v19  ;;  %v986_v60 = vadd.f32 %v954_v9, %v885_v27  ;;  %v652_v41 = vmul.f32 %v1663_v4, %v2028_v26  ;;  %v280_v12 = vmul.f32 %v1642_v0, %v1994_v57  ;;  %v2107_v40 = vld [vmem:[%s1678_s6 + $0xd9] sm:$0xff] }
  0x4e   : > { %v481_v10 = vadd.f32 %v449_v56, %v380_v28  ;;  %v349_v33 = vmul.f32 %v1647_v1, %v2002_v38  ;;  %v450_v47 = vmul.f32 %v1652_v2, %v1504_v13  ;;  %v784_v50 = vadd.f32 %v752_v30, %v683_v61  ;;  %v1508_v56 = vld [vmem:[%s1678_s6 + $0xda] sm:$0xff] }
  0x4f   : > { %v1154_v48 = vmax.f32 %v1941_v35, %v1122_v58  ;;  %v1087_v22 = vadd.f32 %v1055_v59, %v986_v60  ;;  %v753_v52 = vmul.f32 %v1668_v5, %v1505_v49  ;;  %v855_v17 = vmul.f32 %v1673_v6, %v1441_v43 }
  0x50   : > { %v583_v15 = vadd.f32 %v551_v62, %v481_v10  ;;  %v381_v57 = vadd.f32 %v349_v33, %v280_v12  ;;  %v552_v53 = vmul.f32 %v1657_v3, %v2046_v44  ;;  %v886_v13 = vadd.f32 %v854_v55, %v784_v50 }
  0x51   : > { %1187 = vst.msk [vmem:[%s1826_s19 + $0x50] sm:$0xff] %vm1176_vm0, %v1154_v48  ;;  %v1123_v35 = vadd.f32 %v1798_v37, %v1087_v22  ;;  %v956_v54 = vmul.f32 %v1683_v7, %v2078_v21  ;;  %v1057_v51 = vmul.f32 %v1688_v8, %v2081_v16  ;;  %v653_v36 = vmul.f32 %v1663_v4, %v2055_v63  ;;  %v2129_v48 = vld [vmem:[%s1678_s6 + $0xe1] sm:$0xff] }
  0x52   : > { %v684_v23 = vadd.f32 %v652_v41, %v583_v15  ;;  %v482_v34 = vadd.f32 %v450_v47, %v381_v57  ;;  %v281_v11 = vmul.f32 %v1642_v0, %v2017_v18  ;;  %v987_v59 = vadd.f32 %v955_v31, %v886_v13  ;;  %v1443_v47 = vld [vmem:[%s1678_s6 + $0xe0] sm:$0xff] }
  0x53   : > { %v1155_v9 = vmax.f32 %v1969_v32, %v1123_v35  ;;  %v350_v24 = vmul.f32 %v1647_v1, %v2028_v26  ;;  %v451_v25 = vmul.f32 %v1652_v2, %v1505_v49  ;;  %v754_v20 = vmul.f32 %v1668_v5, %v1506_v45  ;;  %v1509_v57 = vld [vmem:[%s1678_s6 + $0xe2] sm:$0xff] }
  0x54   : > { %v785_v42 = vadd.f32 %v753_v52, %v684_v23  ;;  %v584_v39 = vadd.f32 %v552_v53, %v482_v34  ;;  %v856_v30 = vmul.f32 %v1673_v6, %v2098_v14  ;;  %v1088_v32 = vadd.f32 %v1056_v29, %v987_v59 }
  0x55   : > { %1188 = vst.msk [vmem:[%s1826_s19 + $0x58] sm:$0xff] %vm1176_vm0, %v1155_v9  ;;  %v957_v18 = vmul.f32 %v1683_v7, %v2107_v40  ;;  %v382_v19 = vadd.f32 %v350_v24, %v281_v11  ;;  %v553_v49 = vmul.f32 %v1657_v3, %v1441_v43  ;;  %v1058_v55 = vmul.f32 %v1688_v8, %v1508_v56 }
  0x56   : > { %v887_v27 = vadd.f32 %v855_v17, %v785_v42  ;;  %v685_v46 = vadd.f32 %v653_v36, %v584_v39  ;;  %v654_v31 = vmul.f32 %v1663_v4, %v2078_v21  ;;  %v1124_v28 = vadd.f32 %v1798_v37, %v1088_v32  ;;  %v2152_v42 = vld [vmem:[%s1678_s6 + $0xf1] sm:$0xff] }
  0x57   : > { %v483_v62 = vadd.f32 %v451_v25, %v382_v19  ;;  %v282_v29 = vmul.f32 %v1642_v0, %v2046_v44  ;;  %v351_v58 = vmul.f32 %v1647_v1, %v2055_v63  ;;  %v755_v41 = vmul.f32 %v1668_v5, %v2081_v16  ;;  %v1444_v25 = vld [vmem:[%s1678_s6 + $0xf0] sm:$0xff] }
  0x58   : > { %v988_v60 = vadd.f32 %v956_v54, %v887_v27  ;;  %v786_v61 = vadd.f32 %v754_v20, %v685_v46  ;;  %v452_v10 = vmul.f32 %v1652_v2, %v1506_v45  ;;  %v1156_v12 = vmax.f32 %v2002_v38, %v1124_v28  ;;  %v1510_v19 = vld [vmem:[%s1678_s6 + $0xf2] sm:$0xff] }
  0x59   : > { %v585_v33 = vadd.f32 %v553_v49, %v483_v62  ;;  %v383_v22 = vadd.f32 %v351_v58, %v282_v29  ;;  %v554_v44 = vmul.f32 %v1657_v3, %v2098_v14  ;;  %v857_v15 = vmul.f32 %v1673_v6, %v1443_v47 }
  0x5a   : > { %v1089_v50 = vadd.f32 %v1057_v51, %v988_v60  ;;  %v888_v52 = vadd.f32 %v856_v30, %v786_v61  ;;  %v958_v17 = vmul.f32 %v1683_v7, %v2129_v48  ;;  %1189 = vst.msk [vmem:[%s1826_s19 + $0x60] sm:$0xff] %vm1176_vm0, %v1156_v12  ;;  %v1059_v45 = vmul.f32 %v1688_v8, %v1509_v57  ;;  %v2174_v12 = vld [vmem:[%s1678_s6 + $0xf9] sm:$0xff] }
  0x5b   : > { %v686_v38 = vadd.f32 %v654_v31, %v585_v33  ;;  %v484_v53 = vadd.f32 %v452_v10, %v383_v22  ;;  %v655_v35 = vmul.f32 %v1663_v4, %v2107_v40  ;;  %v283_v51 = vmul.f32 %v1642_v0, %v1441_v43  ;;  %v1445_v10 = vld [vmem:[%s1678_s6 + $0xf8] sm:$0xff] }
  0x5c   : > { %v1125_v13 = vadd.f32 %v1798_v37, %v1089_v50  ;;  %v989_v54 = vadd.f32 %v957_v18, %v888_v52  ;;  %v352_v23 = vmul.f32 %v1647_v1, %v2078_v21  ;;  %v756_v11 = vmul.f32 %v1668_v5, %v1508_v56 }
  0x5d   : > { %v787_v34 = vadd.f32 %v755_v41, %v686_v38  ;;  %v586_v36 = vadd.f32 %v554_v44, %v484_v53  ;;  %v453_v9 = vmul.f32 %v1652_v2, %v2081_v16  ;;  %v555_v43 = vmul.f32 %v1657_v3, %v1443_v47 }
  0x5e   : > { %v1157_v59 = vmax.f32 %v2028_v26, %v1125_v13  ;;  %v1090_v24 = vadd.f32 %v1058_v55, %v989_v54  ;;  %v384_v39 = vadd.f32 %v352_v23, %v283_v51  ;;  %v858_v32 = vmul.f32 %v1673_v6, %v1444_v25  ;;  %v1511_v54 = vld [vmem:[%s1678_s6 + $0xfa] sm:$0xff] }
  0x5f   : > { %v889_v20 = vadd.f32 %v857_v15, %v787_v34  ;;  %v687_v30 = vadd.f32 %v655_v35, %v586_v36  ;;  %v959_v18 = vmul.f32 %v1683_v7, %v2152_v42  ;;  %v1060_v16 = vmul.f32 %v1688_v8, %v1510_v19 }
  0x60   : > { %1190 = vst.msk [vmem:[%s1826_s19 + $0x68] sm:$0xff] %vm1176_vm0, %v1157_v59  ;;  %v1126_v26 = vadd.f32 %v1798_v37, %v1090_v24  ;;  %v485_v49 = vadd.f32 %v453_v9, %v384_v39  ;;  %v656_v27 = vmul.f32 %v1663_v4, %v2129_v48  ;;  %v284_v31 = vmul.f32 %v1642_v0, %v2098_v14  ;;  %v2195_v9 = vld [vmem:[%s1678_s6 + $0x109] sm:$0xff] }
  0x61   : > { %v990_v46 = vadd.f32 %v958_v17, %v889_v20  ;;  %v788_v55 = vadd.f32 %v756_v11, %v687_v30  ;;  %v353_v28 = vmul.f32 %v1647_v1, %v2107_v40  ;;  %v757_v58 = vmul.f32 %v1668_v5, %v1509_v57  ;;  %v1446_v11 = vld [vmem:[%s1678_s6 + $0x108] sm:$0xff] }
  0x62   : > { %v1158_v62 = vmax.f32 %v2055_v63, %v1126_v26  ;;  %v587_v29 = vadd.f32 %v555_v43, %v485_v49  ;;  %v454_v60 = vmul.f32 %v1652_v2, %v1508_v56  ;;  %v556_v22 = vmul.f32 %v1657_v3, %v1444_v25 }
  0x63   : > { %v1091_v61 = vadd.f32 %v1059_v45, %v990_v46  ;;  %v890_v41 = vadd.f32 %v858_v32, %v788_v55  ;;  %v385_v33 = vadd.f32 %v353_v28, %v284_v31  ;;  %v859_v44 = vmul.f32 %v1673_v6, %v1445_v10 }
  0x64   : > { %1191 = vst.msk [vmem:[%s1826_s19 + $0x70] sm:$0xff] %vm1176_vm0, %v1158_v62  ;;  %v688_v14 = vadd.f32 %v656_v27, %v587_v29  ;;  %v960_v63 = vmul.f32 %v1683_v7, %v2174_v12  ;;  %v657_v15 = vmul.f32 %v1663_v4, %v2152_v42  ;;  %v285_v38 = vmul.f32 %v1642_v0, %v1443_v47  ;;  %v2215_v62 = vld [vmem:[%s1678_s6 + $0x110] sm:$0xff] }
  0x65   : > { %v1127_v56 = vadd.f32 %v1798_v37, %v1091_v61  ;;  %v991_v50 = vadd.f32 %v959_v18, %v890_v41  ;;  %v486_v52 = vadd.f32 %v454_v60, %v385_v33  ;;  %v354_v45 = vmul.f32 %v1647_v1, %v2129_v48  ;;  %v2222_v29 = vld [vmem:[%s1678_s6 + $0x111] sm:$0xff] }
  0x66   : > { %v789_v17 = vadd.f32 %v757_v58, %v688_v14  ;;  %v455_v53 = vmul.f32 %v1652_v2, %v1509_v57  ;;  %v758_v23 = vmul.f32 %v1668_v5, %v1510_v19  ;;  %v1061_v36 = vmul.f32 %v1688_v8, %v1511_v54 }
  0x67   : > { %v1159_v35 = vmax.f32 %v2078_v21, %v1127_v56  ;;  %v1092_v13 = vadd.f32 %v1060_v16, %v991_v50  ;;  %v588_v51 = vadd.f32 %v556_v22, %v486_v52  ;;  %v386_v47 = vadd.f32 %v354_v45, %v285_v38  ;;  %v1512_v16 = vld [vmem:[%s1678_s6 + $0x10a] sm:$0xff]  ;;  %v1513_v38 = vld [vmem:[%s1678_s6 + $0x112] sm:$0xff] }
  0x68   : > { %v891_v34 = vadd.f32 %v859_v44, %v789_v17  ;;  %v557_v59 = vmul.f32 %v1657_v3, %v1445_v10  ;;  %v860_v24 = vmul.f32 %v1673_v6, %v1446_v11  ;;  %v961_v39 = vmul.f32 %v1683_v7, %v2195_v9 }
  0x69   : > { %1192 = vst.msk [vmem:[%s1826_s19 + $0x78] sm:$0xff] %vm1176_vm0, %v1159_v35  ;;  %v1128_v57 = vadd.f32 %v1798_v37, %v1092_v13  ;;  %v689_v21 = vadd.f32 %v657_v15, %v588_v51  ;;  %v487_v20 = vadd.f32 %v455_v53, %v386_v47  ;;  %v658_v30 = vmul.f32 %v1663_v4, %v2174_v12  ;;  %v2238_v53 = vld [vmem:[%s1678_s6 + $0x120] sm:$0xff] }
  0x6a   : > { %v992_v43 = vadd.f32 %v960_v63, %v891_v34  ;;  %v286_v32 = vmul.f32 %v1642_v0, %v1444_v25  ;;  %v355_v49 = vmul.f32 %v1647_v1, %v2152_v42  ;;  %v456_v27 = vmul.f32 %v1652_v2, %v1510_v19  ;;  %v2241_v35 = vld [vmem:[%s1678_s6 + $0x121] sm:$0xff] }
  0x6b   : > { %v1160_v18 = vmax.f32 %v2107_v40, %v1128_v57  ;;  %v790_v26 = vadd.f32 %v758_v23, %v689_v21  ;;  %v1062_v55 = vmul.f32 %v1688_v8, %v1512_v16  ;;  %v589_v31 = vadd.f32 %v557_v59, %v487_v20 }
  0x6c   : > { %v1093_v46 = vadd.f32 %v1061_v36, %v992_v43  ;;  %v759_v28 = vmul.f32 %v1668_v5, %v1511_v54  ;;  %v861_v40 = vmul.f32 %v1673_v6, %v2215_v62  ;;  %v387_v58 = vadd.f32 %v355_v49, %v286_v32 }
  0x6d   : > { %1193 = vst.msk [vmem:[%s1826_s19 + $0x80] sm:$0xff] %vm1176_vm0, %v1160_v18  ;;  %v892_v25 = vadd.f32 %v860_v24, %v790_v26  ;;  %v558_v19 = vmul.f32 %v1657_v3, %v1446_v11  ;;  %v690_v61 = vadd.f32 %v658_v30, %v589_v31  ;;  %v962_v41 = vmul.f32 %v1683_v7, %v2222_v29  ;;  %v2267_v18 = vld [vmem:[%s1678_s6 + $0x129] sm:$0xff]  ;;  %v2288_v26 = vld [vmem:[%s2554_s1 + $0x7] ss:$0 sm:$0xff]  ;;  %v2303_v31 = vld [vmem:[%s2554_s1] ss:$0 sm:$0xff] }
  0x6e   : > { %v1129_v60 = vadd.f32 %v1798_v37, %v1093_v46  ;;  %v659_v33 = vmul.f32 %v1663_v4, %v2195_v9  ;;  %v488_v14 = vadd.f32 %v456_v27, %v387_v58  ;;  %v287_v44 = vmul.f32 %v1642_v0, %v1445_v10  ;;  %v2296_v46 = vld [vmem:[%s2554_s1 + $0x4] ss:$0 sm:$0xff]  ;;  %v1515_v58 = vld [vmem:[%s1678_s6 + $0x12a] sm:$0xff] }
  0x6f   : > { %v993_v22 = vadd.f32 %v961_v39, %v892_v25  ;;  %v356_v63 = vmul.f32 %v1647_v1, %v2174_v12  ;;  %v791_v50 = vadd.f32 %v759_v28, %v690_v61  ;;  %v760_v52 = vmul.f32 %v1668_v5, %v1512_v16  ;;  %v1514_v39 = vld [vmem:[%s1678_s6 + $0x122] sm:$0xff] }
  0x70   : > { %v1161_v56 = vmax.f32 %v2129_v48, %v1129_v60  ;;  %v457_v15 = vmul.f32 %v1652_v2, %v1511_v54  ;;  %v590_v45 = vadd.f32 %v558_v19, %v488_v14  ;;  %v559_v10 = vmul.f32 %v1657_v3, %v2215_v62  ;;  %v2311_v19 = vld [vmem:[%s2554_s1 + $0x1] ss:$0 sm:$0xff]  ;;  %v2318_v61 = vld [vmem:[%s2554_s1 + $0x2] ss:$0 sm:$0xff] }
  0x71   : > { %v1094_v17 = vadd.f32 %v1062_v55, %v993_v22  ;;  %v388_v13 = vadd.f32 %v356_v63, %v287_v44  ;;  %v893_v48 = vadd.f32 %v861_v40, %v791_v50  ;;  %v1063_v51 = vmul.f32 %v1688_v8, %v1513_v38  ;;  %v2331_v44 = vld [vmem:[%s2554_s1 + $0x5] ss:$0 sm:$0xff] }
  0x72   : > { %1194 = vst.msk [vmem:[%s1826_s19 + $0x88] sm:$0xff] %vm1176_vm0, %v1161_v56  ;;  %v862_v54 = vmul.f32 %v1673_v6, %v2238_v53  ;;  %v963_v23 = vmul.f32 %v1683_v7, %v2241_v35  ;;  %v691_v36 = vadd.f32 %v659_v33, %v590_v45  ;;  %v660_v3 = vmul.f32 %v1663_v4, %v2222_v29  ;;  %v2264_v4 = vld [vmem:[%s1678_s6 + $0x128] sm:$0xff] }
  0x73   : > { %v1130_v34 = vadd.f32 %v1798_v37, %v1094_v17  ;;  %v489_v47 = vadd.f32 %v457_v15, %v388_v13  ;;  %v994_v59 = vadd.f32 %v962_v41, %v893_v48  ;;  %v288_v57 = vmul.f32 %v1642_v0, %v1446_v11  ;;  %v2325_v33 = vld [vmem:[%s2554_s1 + $0x8] ss:$0 sm:$0xff] }
  0x74   : > { %v357_v21 = vmul.f32 %v1647_v1, %v2195_v9  ;;  %v458_v6 = vmul.f32 %v1652_v2, %v1512_v16  ;;  %v792_v24 = vadd.f32 %v760_v52, %v691_v36  ;;  %v761_v20 = vmul.f32 %v1668_v5, %v1513_v38  ;;  %v2272_v1 = vld [vmem:[%s2554_s1 + $0x3] ss:$0 sm:$0xff]  ;;  %v1450_v52 = vld [vmem:[%s1678_s6 + $0x138] sm:$0xff] }
  0x75   : > { %v1162_v7 = vmax.f32 %v2152_v42, %v1130_v34  ;;  %v591_v43 = vadd.f32 %v559_v10, %v489_v47  ;;  %v1095_v30 = vadd.f32 %v1063_v51, %v994_v59  ;;  %v1064_v32 = vmul.f32 %v1688_v8, %v1514_v39  ;;  %v2281_v8 = vld [vmem:[%s2554_s1 + $0x6] ss:$0 sm:$0xff] }
  0x76   : > { %v389_v0 = vadd.f32 %v357_v21, %v288_v57  ;;  %v560_v2 = vmul.f32 %v2272_v1, %v2238_v53  ;;  %v894_v5 = vadd.f32 %v862_v54, %v792_v24  ;;  %v863_v11 = vmul.f32 %v2281_v8, %v2264_v4  ;;  %v1516_v54 = vld [vmem:[%s1678_s6 + $0x13a] sm:$0xff] }
  0x77   : > { %1195 = vst.msk [vmem:[%s1826_s19 + $0x90] sm:$0xff] %vm1176_vm0, %v1162_v7  ;;  %v692_v42 = vadd.f32 %v660_v3, %v591_v43  ;;  %v964_v16 = vmul.f32 %v2288_v26, %v2267_v18  ;;  %v1131_v49 = vadd.f32 %v1798_v37, %v1095_v30  ;;  %v661_v55 = vmul.f32 %v2296_v46, %v2241_v35  ;;  %v1451_v24 = vld [vmem:[%s1678_s6 + $0x140] sm:$0xff] }
  0x78   : > { %v490_v27 = vadd.f32 %v458_v6, %v389_v0  ;;  %v289_v28 = vmul.f32 %v2303_v31, %v2215_v62  ;;  %v995_v25 = vadd.f32 %v963_v23, %v894_v5  ;;  %v358_v60 = vmul.f32 %v2311_v19, %v2222_v29  ;;  %v2360_v30 = vld [vmem:[%s1678_s6 + $0x141] sm:$0xff] }
  0x79   : > { %v793_v40 = vadd.f32 %v761_v20, %v692_v42  ;;  %v459_v62 = vmul.f32 %v2318_v61, %v1513_v38  ;;  %v1163_v41 = vmax.f32 %v2174_v12, %v1131_v49  ;;  %v1065_v22 = vmul.f32 %v2325_v33, %v1515_v58  ;;  %v2336_v12 = vld [vmem:[%s1678_s6 + $0x139] sm:$0xff] }
  0x7a   : > { %v592_v14 = vadd.f32 %v560_v2, %v490_v27  ;;  %v762_v63 = vmul.f32 %v2331_v44, %v1514_v39  ;;  %v1096_v56 = vadd.f32 %v1064_v32, %v995_v25  ;;  %v390_v15 = vadd.f32 %v358_v60, %v289_v28 }
  0x7b   : > { %v895_v50 = vadd.f32 %v863_v11, %v793_v40  ;;  %v561_v17 = vmul.f32 %v2272_v1, %v2264_v4  ;;  %1196 = vst.msk [vmem:[%s1826_s19 + $0x98] sm:$0xff] %vm1176_vm0, %v1163_v41  ;;  %v864_v45 = vmul.f32 %v2281_v8, %v1450_v52  ;;  %v965_v13 = vmul.f32 %v2288_v26, %v2336_v12  ;;  %v1517_v40 = vld [vmem:[%s1678_s6 + $0x142] sm:$0xff]  ;;  %v2380_v41 = vld [vmem:[%s1678_s6 + $0x151] sm:$0xff] }
  0x7c   : > { %v693_v38 = vadd.f32 %v661_v55, %v592_v14  ;;  %v662_v10 = vmul.f32 %v2296_v46, %v2267_v18  ;;  %v1132_v48 = vadd.f32 %v1798_v37, %v1096_v56  ;;  %v491_v23 = vadd.f32 %v459_v62, %v390_v15  ;;  %v1452_v62 = vld [vmem:[%s1678_s6 + $0x150] sm:$0xff] }
  0x7d   : > { %v996_v51 = vadd.f32 %v964_v16, %v895_v50  ;;  %v290_v34 = vmul.f32 %v2303_v31, %v2238_v53  ;;  %v1066_v47 = vmul.f32 %v2325_v33, %v1516_v54  ;;  %v359_v3 = vmul.f32 %v2311_v19, %v2241_v35 }
  0x7e   : > { %v794_v36 = vadd.f32 %v762_v63, %v693_v38  ;;  %v460_v59 = vmul.f32 %v2318_v61, %v1514_v39  ;;  %v1164_v57 = vmax.f32 %v2195_v9, %v1132_v48  ;;  %v593_v6 = vadd.f32 %v561_v17, %v491_v23  ;;  %v1518_v23 = vld [vmem:[%s1678_s6 + $0x152] sm:$0xff] }
  0x7f   : > { %v1097_v21 = vadd.f32 %v1065_v22, %v996_v51  ;;  %v763_v7 = vmul.f32 %v2331_v44, %v1515_v58  ;;  %v865_v20 = vmul.f32 %v2281_v8, %v1451_v24  ;;  %v391_v53 = vadd.f32 %v359_v3, %v290_v34  ;;  %v1453_v3 = vld [vmem:[%s1678_s6 + $0x158] sm:$0xff] }
  0x80   : > { %v896_v43 = vadd.f32 %v864_v45, %v794_v36  ;;  %v562_v32 = vmul.f32 %v2272_v1, %v1450_v52  ;;  %1197 = vst.msk [vmem:[%s1826_s19 + $0xa0] sm:$0xff] %vm1176_vm0, %v1164_v57  ;;  %v694_v9 = vadd.f32 %v662_v10, %v593_v6  ;;  %v966_v0 = vmul.f32 %v2288_v26, %v2360_v30 }
  0x81   : > { %v1133_v39 = vadd.f32 %v1798_v37, %v1097_v21  ;;  %v663_v2 = vmul.f32 %v2296_v46, %v2336_v12  ;;  %v492_v42 = vadd.f32 %v460_v59, %v391_v53  ;;  %v291_v11 = vmul.f32 %v2303_v31, %v2264_v4  ;;  %v2402_v59 = vld [vmem:[%s1678_s6 + $0x159] sm:$0xff] }
  0x82   : > { %v997_v5 = vadd.f32 %v965_v13, %v896_v43  ;;  %v360_v16 = vmul.f32 %v2311_v19, %v2267_v18  ;;  %v795_v27 = vadd.f32 %v763_v7, %v694_v9  ;;  %v764_v55 = vmul.f32 %v2331_v44, %v1516_v54  ;;  %v2413_v7 = vld [vmem:[%s2555_s2] ss:$0 sm:$0xff] }
  0x83   : > { %v1165_v49 = vmax.f32 %v2222_v29, %v1133_v39  ;;  %v461_v28 = vmul.f32 %v2318_v61, %v1515_v58  ;;  %v594_v60 = vadd.f32 %v562_v32, %v492_v42  ;;  %v563_v14 = vmul.f32 %v2272_v1, %v1451_v24 }
  0x84   : > { %v1098_v25 = vadd.f32 %v1066_v47, %v997_v5  ;;  %v392_v22 = vadd.f32 %v360_v16, %v291_v11  ;;  %v897_v4 = vadd.f32 %v865_v20, %v795_v27  ;;  %v1067_v29 = vmul.f32 %v2325_v33, %v1517_v40 }
  0x85   : > { %1198 = vst.msk [vmem:[%s1826_s19 + $0xa8] sm:$0xff] %vm1176_vm0, %v1165_v49  ;;  %v866_v63 = vmul.f32 %v2281_v8, %v1452_v62  ;;  %v967_v58 = vmul.f32 %v2288_v26, %v2380_v41  ;;  %v695_v50 = vadd.f32 %v663_v2, %v594_v60  ;;  %v664_v17 = vmul.f32 %v2296_v46, %v2360_v30 }
  0x86   : > { %v1134_v56 = vadd.f32 %v1798_v37, %v1098_v25  ;;  %v493_v15 = vadd.f32 %v461_v28, %v392_v22  ;;  %v998_v38 = vadd.f32 %v966_v0, %v897_v4  ;;  %v292_v45 = vmul.f32 %v2303_v31, %v1450_v52  ;;  %v1519_v0 = vld [vmem:[%s1678_s6 + $0x15a] sm:$0xff]  ;;  %v2428_v28 = vld [vmem:[%s1678_s6 + $0x169] sm:$0xff] }
  0x87   : > { %v361_v13 = vmul.f32 %v2311_v19, %v2336_v12  ;;  %v462_v10 = vmul.f32 %v2318_v61, %v1516_v54  ;;  %v796_v51 = vadd.f32 %v764_v55, %v695_v50  ;;  %v765_v34 = vmul.f32 %v2331_v44, %v1517_v40 }
  0x88   : > { %v1166_v48 = vmax.f32 %v2241_v35, %v1134_v56  ;;  %v595_v37 = vadd.f32 %v563_v14, %v493_v15  ;;  %v1099_v36 = vadd.f32 %v1067_v29, %v998_v38  ;;  %v1068_v47 = vmul.f32 %v2325_v33, %v1518_v23 }
  0x89   : > { %v393_v52 = vadd.f32 %v361_v13, %v292_v45  ;;  %v564_v57 = vmul.f32 %v2272_v1, %v1452_v62  ;;  %v898_v54 = vadd.f32 %v866_v63, %v796_v51  ;;  %v867_v35 = vmul.f32 %v2281_v8, %v1453_v3  ;;  %v1520_v63 = vld [vmem:[%s1678_s6 + $0x16a] sm:$0xff] }
  0x8a   : > { %1199 = vst.msk [vmem:[%s1826_s19 + $0xb0] sm:$0xff] %vm1176_vm0, %v1166_v48  ;;  %v696_v21 = vadd.f32 %v664_v17, %v595_v37  ;;  %v968_v6 = vmul.f32 %v2288_v26, %v2402_v59  ;;  %v1135_v43 = vadd.f32 %v2413_v7, %v1099_v36  ;;  %v665_v53 = vmul.f32 %v2296_v46, %v2380_v41  ;;  %v1455_v51 = vld [vmem:[%s1678_s6 + $0x170] sm:$0xff] }
  0x8b   : > { %v494_v20 = vadd.f32 %v462_v10, %v393_v52  ;;  %v293_v32 = vmul.f32 %v2303_v31, %v1451_v24  ;;  %v999_v39 = vadd.f32 %v967_v58, %v898_v54  ;;  %v362_v2 = vmul.f32 %v2311_v19, %v2360_v30  ;;  %v1454_v24 = vld [vmem:[%s1678_s6 + $0x168] sm:$0xff]  ;;  %v2450_v36 = vld [vmem:[%s1678_s6 + $0x171] sm:$0xff] }
  0x8c   : > { %v797_v9 = vadd.f32 %v765_v34, %v696_v21  ;;  %v463_v5 = vmul.f32 %v2318_v61, %v1517_v40  ;;  %v1167_v42 = vmax.f32 %v2267_v18, %v1135_v43  ;;  %v1069_v11 = vmul.f32 %v2325_v33, %v1519_v0 }
  0x8d   : > { %v596_v16 = vadd.f32 %v564_v57, %v494_v20  ;;  %v766_v49 = vmul.f32 %v2331_v44, %v1518_v23  ;;  %v1100_v27 = vadd.f32 %v1068_v47, %v999_v39  ;;  %v394_v25 = vadd.f32 %v362_v2, %v293_v32 }
  0x8e   : > { %v899_v55 = vadd.f32 %v867_v35, %v797_v9  ;;  %v565_v60 = vmul.f32 %v2272_v1, %v1453_v3  ;;  %1200 = vst.msk [vmem:[%s1826_s19 + $0xb8] sm:$0xff] %vm1176_vm0, %v1167_v42  ;;  %v868_v40 = vmul.f32 %v2281_v8, %v1454_v24  ;;  %v969_v18 = vmul.f32 %v2288_v26, %v2428_v28  ;;  %v1521_v9 = vld [vmem:[%s1678_s6 + $0x172] sm:$0xff]  ;;  %v2469_v42 = vld [vmem:[%s1678_s6 + $0x181] sm:$0xff] }
  0x8f   : > { %v697_v22 = vadd.f32 %v665_v53, %v596_v16  ;;  %v666_v14 = vmul.f32 %v2296_v46, %v2402_v59  ;;  %v1136_v4 = vadd.f32 %v2413_v7, %v1100_v27  ;;  %v495_v58 = vadd.f32 %v463_v5, %v394_v25  ;;  %v1456_v5 = vld [vmem:[%s1678_s6 + $0x180] sm:$0xff] }
  0x90   : > { %v1000_v29 = vadd.f32 %v968_v6, %v899_v55  ;;  %v294_v56 = vmul.f32 %v2303_v31, %v1452_v62  ;;  %v1070_v15 = vmul.f32 %v2325_v33, %v1520_v63  ;;  %v363_v17 = vmul.f32 %v2311_v19, %v2380_v41 }
  0x91   : > { %v798_v50 = vadd.f32 %v766_v49, %v697_v22  ;;  %v464_v38 = vmul.f32 %v2318_v61, %v1518_v23  ;;  %v1168_v45 = vmax.f32 %v2336_v12, %v1136_v4  ;;  %v597_v10 = vadd.f32 %v565_v60, %v495_v58  ;;  %v1522_v58 = vld [vmem:[%s1678_s6 + $0x182] sm:$0xff] }
  0x92   : > { %v1101_v13 = vadd.f32 %v1069_v11, %v1000_v29  ;;  %v767_v48 = vmul.f32 %v2331_v44, %v1519_v0  ;;  %v869_v34 = vmul.f32 %v2281_v8, %v1455_v51  ;;  %v395_v62 = vadd.f32 %v363_v17, %v294_v56 }
  0x93   : > { %v900_v37 = vadd.f32 %v868_v40, %v798_v50  ;;  %v566_v47 = vmul.f32 %v2272_v1, %v1454_v24  ;;  %1201 = vst.msk [vmem:[%s1826_s19 + $0xc0] sm:$0xff] %vm1176_vm0, %v1168_v45  ;;  %v698_v12 = vadd.f32 %v666_v14, %v597_v10  ;;  %v970_v52 = vmul.f32 %v2288_v26, %v2450_v36  ;;  %v2491_v45 = vld [vmem:[%s1678_s6 + $0x189] sm:$0xff] }
  0x94   : > { %v1137_v23 = vadd.f32 %v2413_v7, %v1101_v13  ;;  %v667_v57 = vmul.f32 %v2296_v46, %v2428_v28  ;;  %v496_v21 = vadd.f32 %v464_v38, %v395_v62  ;;  %v295_v35 = vmul.f32 %v2303_v31, %v1453_v3  ;;  %v1457_v38 = vld [vmem:[%s1678_s6 + $0x188] sm:$0xff] }
  0x95   : > { %v1001_v54 = vadd.f32 %v969_v18, %v900_v37  ;;  %v364_v6 = vmul.f32 %v2311_v19, %v2402_v59  ;;  %v799_v20 = vadd.f32 %v767_v48, %v698_v12  ;;  %v768_v53 = vmul.f32 %v2331_v44, %v1520_v63 }
  0x96   : > { %v1169_v43 = vmax.f32 %v2360_v30, %v1137_v23  ;;  %v465_v32 = vmul.f32 %v2318_v61, %v1519_v0  ;;  %v598_v2 = vadd.f32 %v566_v47, %v496_v21  ;;  %v567_v16 = vmul.f32 %v2272_v1, %v1455_v51 }
  0x97   : > { %v1102_v39 = vadd.f32 %v1070_v15, %v1001_v54  ;;  %v396_v11 = vadd.f32 %v364_v6, %v295_v35  ;;  %v901_v3 = vadd.f32 %v869_v34, %v799_v20  ;;  %v1071_v30 = vmul.f32 %v2325_v33, %v1521_v9 }
  0x98   : > { %1202 = vst.msk [vmem:[%s1826_s19 + $0xc8] sm:$0xff] %vm1176_vm0, %v1169_v43  ;;  %v870_v49 = vmul.f32 %v2281_v8, %v1456_v5  ;;  %v971_v0 = vmul.f32 %v2288_v26, %v2469_v42  ;;  %v699_v55 = vadd.f32 %v667_v57, %v598_v2  ;;  %v668_v60 = vmul.f32 %v2296_v46, %v2450_v36  ;;  %v1458_v57 = vld [vmem:[%s1678_s6 + $0x198] sm:$0xff] }
  0x99   : > { %v1138_v27 = vadd.f32 %v2413_v7, %v1102_v39  ;;  %v497_v25 = vadd.f32 %v465_v32, %v396_v11  ;;  %v1002_v22 = vadd.f32 %v970_v52, %v901_v3  ;;  %v296_v40 = vmul.f32 %v2303_v31, %v1454_v24  ;;  %v1523_v52 = vld [vmem:[%s1678_s6 + $0x18a] sm:$0xff]  ;;  %v1524_v2 = vld [vmem:[%s1678_s6 + $0x19a] sm:$0xff] }
  0x9a   : > { %v365_v18 = vmul.f32 %v2311_v19, %v2428_v28  ;;  %v466_v14 = vmul.f32 %v2318_v61, %v1520_v63  ;;  %v800_v29 = vadd.f32 %v768_v53, %v699_v55  ;;  %v769_v50 = vmul.f32 %v2331_v44, %v1521_v9  ;;  %v1491_v53 = vld [vmem:[%s1678_s6 + $0x199] sm:$0xff] }
  0x9b   : > { %v1170_v4 = vmax.f32 %v2380_v41, %v1138_v27  ;;  %v599_v56 = vadd.f32 %v567_v16, %v497_v25  ;;  %v1103_v15 = vadd.f32 %v1071_v30, %v1002_v22  ;;  %v1072_v17 = vmul.f32 %v2325_v33, %v1522_v58 }
  0x9c   : > { %v397_v24 = vadd.f32 %v365_v18, %v296_v40  ;;  %v568_v13 = vmul.f32 %v2272_v1, %v1456_v5  ;;  %v902_v63 = vadd.f32 %v870_v49, %v800_v29  ;;  %v871_v10 = vmul.f32 %v2281_v8, %v1457_v38 }
  0x9d   : > { %1203 = vst.msk [vmem:[%s1826_s19 + $0xd0] sm:$0xff] %vm1176_vm0, %v1170_v4  ;;  %v700_v41 = vadd.f32 %v668_v60, %v599_v56  ;;  %v972_v48 = vmul.f32 %v2288_v26, %v2491_v45  ;;  %v1139_v37 = vadd.f32 %v2413_v7, %v1103_v15  ;;  %v669_v62 = vmul.f32 %v2296_v46, %v2469_v42  ;;  %v1492_v60 = vld [vmem:[%s1678_s6 + $0x1a1] sm:$0xff] }
  0x9e   : > { %v498_v34 = vadd.f32 %v466_v14, %v397_v24  ;;  %v297_v47 = vmul.f32 %v2303_v31, %v1455_v51  ;;  %v1003_v23 = vadd.f32 %v971_v0, %v902_v63  ;;  %v366_v54 = vmul.f32 %v2311_v19, %v2450_v36 }
  0x9f   : > { %v801_v12 = vadd.f32 %v769_v50, %v700_v41  ;;  %v467_v21 = vmul.f32 %v2318_v61, %v1521_v9  ;;  %v1171_v35 = vmax.f32 %v2402_v59, %v1139_v37  ;;  %v1073_v6 = vmul.f32 %v2325_v33, %v1523_v52 }
  0xa0   : > { %v600_v43 = vadd.f32 %v568_v13, %v498_v34  ;;  %v770_v20 = vmul.f32 %v2331_v44, %v1522_v58  ;;  %v1104_v31 = vadd.f32 %v1072_v17, %v1003_v23  ;;  %v398_v32 = vadd.f32 %v366_v54, %v297_v47 }
  0xa1   : > { %v903_v51 = vadd.f32 %v871_v10, %v801_v12  ;;  %v569_v39 = vmul.f32 %v2272_v1, %v1457_v38  ;;  %1204 = vst.msk [vmem:[%s1826_s19 + $0xd8] sm:$0xff] %vm1176_vm0, %v1171_v35  ;;  %v872_v61 = vmul.f32 %v2281_v8, %v1458_v57  ;;  %v670_v11 = vmul.f32 %v2296_v46, %v2491_v45  ;;  %v1459_v1 = vld [vmem:[%s1678_s6 + $0x1a0] sm:$0xff] }
  0xa2   : > { %v701_v19 = vadd.f32 %v669_v62, %v600_v43  ;;  %v1140_v59 = vadd.f32 %v2413_v7, %v1104_v31  ;;  %v499_v5 = vadd.f32 %v467_v21, %v398_v32  ;;  %v973_v3 = vmul.f32 %v2288_v26, %v1491_v53 }
  0xa3   : > { %v1004_v9 = vadd.f32 %v972_v48, %v903_v51  ;;  %v771_v27 = vmul.f32 %v2331_v44, %v1523_v52  ;;  %v1074_v25 = vmul.f32 %v2325_v33, %v1524_v2  ;;  %v873_v40 = vmul.f32 %v2281_v8, %v1459_v1 }
  0xa4   : > { %v802_v16 = vadd.f32 %v770_v20, %v701_v19  ;;  %v1172_v30 = vmax.f32 %v2428_v28, %v1140_v59  ;;  %v601_v0 = vadd.f32 %v569_v39, %v499_v5  ;;  %v1525_v28 = vld [vmem:[%s1678_s6 + $0x1a2] sm:$0xff]  ;;  %v974_v44 = vmul.f32 %v2288_v26, %v1492_v60 }
  0xa5   : > { %v1105_v49 = vadd.f32 %v1073_v6, %v1004_v9  ;;  %v1075_v56 = vmul.f32 %v2325_v33, %v1525_v28 }
  0xa6   : > { %v904_v55 = vadd.f32 %v872_v61, %v802_v16  ;;  %1205 = vst.msk [vmem:[%s1826_s19 + $0xe0] sm:$0xff] %vm1176_vm0, %v1172_v30  ;;  %v702_v22 = vadd.f32 %v670_v11, %v601_v0 }
  0xa7   : > { %v1141_v46 = vadd.f32 %v2413_v7, %v1105_v49 }
  0xa8   : > { %v1005_v18 = vadd.f32 %v973_v3, %v904_v55  ;;  %v803_v4 = vadd.f32 %v771_v27, %v702_v22 }
  0xa9   : > { %v1173_v14 = vmax.f32 %v2450_v36, %v1141_v46 }
  0xaa   : > { %v1106_v29 = vadd.f32 %v1074_v25, %v1005_v18  ;;  %v905_v58 = vadd.f32 %v873_v40, %v803_v4 }
  0xab   : > { %1206 = vst.msk [vmem:[%s1826_s19 + $0xe8] sm:$0xff] %vm1176_vm0, %v1173_v14 }
  0xac   : > { %v1142_v50 = vadd.f32 %v2413_v7, %v1106_v29  ;;  %v1006_v15 = vadd.f32 %v974_v44, %v905_v58 }
  0xae   : > { %v1174_v17 = vmax.f32 %v2469_v42, %v1142_v50  ;;  %v1107_v8 = vadd.f32 %v1075_v56, %v1006_v15 }
  0xb0   : > { %1207 = vst.msk [vmem:[%s1826_s19 + $0xf0] sm:$0xff] %vm1176_vm0, %v1174_v17  ;;  %v1143_v38 = vadd.f32 %v2413_v7, %v1107_v8 }
  0xb2   : > { %v1175_v36 = vmax.f32 %v2491_v45, %v1143_v38 }
  0xb4   : > { %1208 = vst.msk [vmem:[%s1826_s19 + $0xf8] sm:$0xff] %vm1176_vm0, %v1175_v36 }
  0xb5 PF: > { %s13_s14 = sadd.s32 1, %s1597_s14   ;;  %s2557_s12 = smov %s1593_s13 }
  0xb6   : > { %p10_p5 = scmp.ge.s32.totalorder %s13_s14, 4   ;;  %s2558_s13 = smov %s2560_s15 }
  0xb8   :  { %12 = sbr.rel (!%p10_p5) target bundleno = 2 (0x2), region = 78 }

</bundles_post_ra>
